<compile_context>
chip_gen: v7x
topology: tpu7x:2x2x1
jax: 0.10.0
libtpu: 0.0.40
codegen_flags: <defaults>
</compile_context>

<pallas_src>
import numpy as np
import jax
import jax.numpy as jnp
from jax import lax
from jax.experimental import pallas as pl
from jax.experimental.pallas import tpu as pltpu


def _vmem_capacity_bytes():
    try:
        return int(pltpu.get_tpu_info().vmem_capacity_bytes)
    except Exception:
        return 64 * 1024 * 1024  # conservative: v7x per-TensorCore VMEM


def _make_vmem_gather_kernel(rows_per_step, G, D):
    """Table resident in VMEM; gather rows via dynamic-sublane Ref reads."""
    chunk = rows_per_step * G

    def kernel(idx_ref, tbl_ref, out_ref):
        # idx_ref: scalar-prefetched flattened (x + offsets) indices in SMEM.
        base = pl.program_id(0) * chunk

        if rows_per_step * G <= 64:
            # Fully static unroll: every store has static sublane/lane offsets.
            for r in range(rows_per_step):
                for g in range(G):
                    row = idx_ref[base + r * G + g]
                    out_ref[r:r + 1, g * D:(g + 1) * D] = tbl_ref[pl.ds(row, 1), :]
        else:
            def row_body(r, carry):
                for g in range(G):  # static inner unroll keeps lane offsets static
                    row = idx_ref[base + r * G + g]
                    out_ref[pl.ds(r, 1), pl.ds(g * D, D)] = tbl_ref[pl.ds(row, 1), :]
                return carry

            lax.fori_loop(0, rows_per_step, row_body, 0)

    return kernel


def _make_hbm_gather_kernel(rows_per_step, G, D, n_buf):
    """Fallback: table stays in HBM; n_buf-deep pipelined per-row DMA gather."""
    chunk = rows_per_step * G

    def kernel(idx_ref, tbl_hbm, out_ref, buf, sem):
        base = pl.program_id(0) * chunk

        def start(j):
            slot = j % n_buf
            row = idx_ref[base + j]
            pltpu.make_async_copy(
                tbl_hbm.at[pl.ds(row, 1), :], buf.at[slot], sem.at[slot]
            ).start()

        for j in range(n_buf):  # prime the pipeline
            start(j)

        def row_body(r, carry):
            for g in range(G):
                j = r * G + g
                slot = j % n_buf
                pltpu.make_async_copy(
                    tbl_hbm.at[pl.ds(0, 1), :], buf.at[slot], sem.at[slot]
                ).wait()
                out_ref[pl.ds(r, 1), pl.ds(g * D, D)] = buf[slot]

                @pl.when(j + n_buf < chunk)
                def _():
                    start(j + n_buf)

            return carry

        lax.fori_loop(0, rows_per_step, row_body, 0)

    return kernel


def features_embedding_fwd(x, table, offsets):
    """x: (B, F) int, table: (V, D) float32, offsets: (F,) int -> (B, F, D)."""
    B, F = x.shape
    V, D = table.shape
    BF = B * F

    # Pack G embedding rows per 128-wide output row (lane-dense stores) when possible.
    G = (128 // D) if (D <= 128 and 128 % D == 0) else 1
    lanes = G * D
    n_rows = (BF + G - 1) // G

    # >= 8 sublanes of output per step; up to 64 packed rows (256 indices at D=32).
    rows_per_step = min(64, ((n_rows + 7) // 8) * 8)
    n_rows_pad = ((n_rows + rows_per_step - 1) // rows_per_step) * rows_per_step
    n_steps = n_rows_pad // rows_per_step
    bf_pad = n_rows_pad * G

    # Fold per-field offsets into the indices, clamp defensively (gathers have no
    # bounds check; NOTE this silently remaps out-of-range indices instead of
    # erroring like torch.nn.Embedding), pad the tail (padded rows gather row 0).
    idx = (x.astype(jnp.int32) + offsets.astype(jnp.int32)[None, :]).reshape(BF)
    idx = jnp.clip(idx, 0, V - 1)
    if bf_pad != BF:
        idx = jnp.pad(idx, (0, bf_pad - BF))

    itemsize = np.dtype(table.dtype).itemsize
    table_bytes = V * D * itemsize
    out_block_bytes = rows_per_step * lanes * itemsize
    cap = _vmem_capacity_bytes()
    # 2x table (pipeline may double-buffer the resident input) + 2 out buffers + slack.
    vmem_need = 2 * table_bytes + 2 * out_block_bytes + (1 << 20)
    resident = vmem_need <= int(0.6 * cap)

    cost = pl.CostEstimate(
        flops=0,
        transcendentals=0,
        bytes_accessed=int(table_bytes + 2 * bf_pad * D * itemsize + bf_pad * 4),
    )
    vmem_limit = None if vmem_need <= (32 << 20) else int(min(cap, vmem_need + (8 << 20)))
    cparams = pltpu.CompilerParams(
        dimension_semantics=("parallel",),
        vmem_limit_bytes=vmem_limit,
    )

    out_shape = jax.ShapeDtypeStruct((n_rows_pad, lanes), table.dtype)
    out_spec = pl.BlockSpec((rows_per_step, lanes), lambda i, idx_s: (i, 0))

    if resident:
        kernel = _make_vmem_gather_kernel(rows_per_step, G, D)
        grid_spec = pltpu.PrefetchScalarGridSpec(
            num_scalar_prefetch=1,
            grid=(n_steps,),
            in_specs=[pl.BlockSpec((V, D), lambda i, idx_s: (0, 0))],  # VMEM-resident
            out_specs=out_spec,
        )
    else:
        n_buf = 4
        kernel = _make_hbm_gather_kernel(rows_per_step, G, D, n_buf)
        grid_spec = pltpu.PrefetchScalarGridSpec(
            num_scalar_prefetch=1,
            grid=(n_steps,),
            in_specs=[pl.BlockSpec(memory_space=pl.ANY)],  # table stays in HBM
            out_specs=out_spec,
            scratch_shapes=[
                pltpu.VMEM((n_buf, 1, D), table.dtype),
                pltpu.SemaphoreType.DMA((n_buf,)),
            ],
        )

    out = pl.pallas_call(
        kernel,
        out_shape=out_shape,
        grid_spec=grid_spec,
        compiler_params=cparams,
        cost_estimate=cost,
    )(idx, table)

    # Unpack lane-packed rows, drop padding. Reshapes are free (layout plumbing).
    return out.reshape(n_rows_pad * G, D)[:BF].reshape(B, F, D)


def xavier_uniform(key, shape, dtype=jnp.float32):
    # torch.nn.init.xavier_uniform_ on a 2-D (num_embeddings, embed_dim) weight.
    fan_out, fan_in = shape[0], shape[1]
    bound = float(np.sqrt(6.0 / (fan_in + fan_out)))
    return jax.random.uniform(key, shape, dtype=dtype, minval=-bound, maxval=bound)


if __name__ == "__main__":
    field_dims = (10, 20, 30, 40)          # sum = 100 -> vocab size
    embed_dim = 32
    batch = 8
    num_fields = len(field_dims)

    key = jax.random.PRNGKey(0)
    k_w, k_x = jax.random.split(key)

    vocab = int(sum(field_dims))
    table = xavier_uniform(k_w, (vocab, embed_dim))        # embedding.weight

    # offsets = (0, *cumsum(field_dims)[:-1])
    offsets = jnp.asarray(np.array((0, *np.cumsum(field_dims)[:-1]), dtype=np.int32))

    # raw per-field indices: x[b, f] in [0, field_dims[f])
    maxvals = jnp.asarray(np.array(field_dims, dtype=np.int32))[None, :]
    x = (
        jax.random.randint(k_x, (batch, num_fields), 0, 1_000_000, dtype=jnp.int32)
        % maxvals
    )

    out = jax.block_until_ready(features_embedding_fwd(x, table, offsets))

    # pure-JAX reference (plain gather) for a sanity check
    ref = table[x + offsets[None, :]]
    assert out.shape == (batch, num_fields, embed_dim)
    assert out.dtype == table.dtype
    np.testing.assert_allclose(np.asarray(out), np.asarray(ref), rtol=0, atol=0)

    print("KERNEL_OK")
</pallas_src>

<mosaic_0001>
module attributes {stable_mosaic.version = 11 : i64} {
  func.func @kernel(%arg0: i32, %arg1: memref<32xi32, #tpu.memory_space<smem>>, %arg2: memref<100x32xf32, #tpu.memory_space<vmem>>, %arg3: memref<8x128xf32, #tpu.memory_space<vmem>>) attributes {dimension_semantics = [#tpu.dimension_semantics<parallel>], iteration_bounds = array<i64: 1>, scalar_prefetch = 1 : i64, scratch_operands = 0 : i64, tpu.core_type = #tpu.core_type<tc>, window_params = [{pipeline_mode = #tpu.pipeline_mode<synchronous>, transform_indices = @transform_0, window_bounds = array<i64: 100, 32>}, {transform_indices = @transform_1, window_bounds = array<i64: 8, 128>}]} {
    %c32_i32 = arith.constant 32 : i32
    %0 = arith.muli %arg0, %c32_i32 : i32
    %c0_i32 = arith.constant 0 : i32
    %1 = arith.addi %0, %c0_i32 : i32
    %c0_i32_0 = arith.constant 0 : i32
    %2 = arith.addi %1, %c0_i32_0 : i32
    %3 = arith.index_cast %2 : i32 to index
    %4 = memref.load %arg1[%3] : memref<32xi32, #tpu.memory_space<smem>>
    %5 = arith.index_cast %4 : i32 to index
    %c0 = arith.constant 0 : index
    %6 = vector.load %arg2[%5, %c0] : memref<100x32xf32, #tpu.memory_space<vmem>>, vector<1x32xf32>
    %c0_1 = arith.constant 0 : index
    %c0_2 = arith.constant 0 : index
    %7 = vector.load %arg3[%c0_1, %c0_2] : memref<8x128xf32, #tpu.memory_space<vmem>>, vector<1x32xf32>
    tpu.vector_store %arg3[%c0_1, %c0_2], %6 {strides = array<i32>} : memref<8x128xf32, #tpu.memory_space<vmem>>, vector<1x32xf32>,
    %c0_i32_3 = arith.constant 0 : i32
    %8 = arith.addi %0, %c0_i32_3 : i32
    %c1_i32 = arith.constant 1 : i32
    %9 = arith.addi %8, %c1_i32 : i32
    %10 = arith.index_cast %9 : i32 to index
    %11 = memref.load %arg1[%10] : memref<32xi32, #tpu.memory_space<smem>>
    %12 = arith.index_cast %11 : i32 to index
    %c0_4 = arith.constant 0 : index
    %13 = vector.load %arg2[%12, %c0_4] : memref<100x32xf32, #tpu.memory_space<vmem>>, vector<1x32xf32>
    %c0_5 = arith.constant 0 : index
    %c32 = arith.constant 32 : index
    %14 = vector.load %arg3[%c0_5, %c32] : memref<8x128xf32, #tpu.memory_space<vmem>>, vector<1x32xf32>
    tpu.vector_store %arg3[%c0_5, %c32], %13 {strides = array<i32>} : memref<8x128xf32, #tpu.memory_space<vmem>>, vector<1x32xf32>,
    %c0_i32_6 = arith.constant 0 : i32
    %15 = arith.addi %0, %c0_i32_6 : i32
    %c2_i32 = arith.constant 2 : i32
    %16 = arith.addi %15, %c2_i32 : i32
    %17 = arith.index_cast %16 : i32 to index
    %18 = memref.load %arg1[%17] : memref<32xi32, #tpu.memory_space<smem>>
    %19 = arith.index_cast %18 : i32 to index
    %c0_7 = arith.constant 0 : index
    %20 = vector.load %arg2[%19, %c0_7] : memref<100x32xf32, #tpu.memory_space<vmem>>, vector<1x32xf32>
    %c0_8 = arith.constant 0 : index
    %c64 = arith.constant 64 : index
    %21 = vector.load %arg3[%c0_8, %c64] : memref<8x128xf32, #tpu.memory_space<vmem>>, vector<1x32xf32>
    tpu.vector_store %arg3[%c0_8, %c64], %20 {strides = array<i32>} : memref<8x128xf32, #tpu.memory_space<vmem>>, vector<1x32xf32>,
    %c0_i32_9 = arith.constant 0 : i32
    %22 = arith.addi %0, %c0_i32_9 : i32
    %c3_i32 = arith.constant 3 : i32
    %23 = arith.addi %22, %c3_i32 : i32
    %24 = arith.index_cast %23 : i32 to index
    %25 = memref.load %arg1[%24] : memref<32xi32, #tpu.memory_space<smem>>
    %26 = arith.index_cast %25 : i32 to index
    %c0_10 = arith.constant 0 : index
    %27 = vector.load %arg2[%26, %c0_10] : memref<100x32xf32, #tpu.memory_space<vmem>>, vector<1x32xf32>
    %c0_11 = arith.constant 0 : index
    %c96 = arith.constant 96 : index
    %28 = vector.load %arg3[%c0_11, %c96] : memref<8x128xf32, #tpu.memory_space<vmem>>, vector<1x32xf32>
    tpu.vector_store %arg3[%c0_11, %c96], %27 {strides = array<i32>} : memref<8x128xf32, #tpu.memory_space<vmem>>, vector<1x32xf32>,
    %c4_i32 = arith.constant 4 : i32
    %29 = arith.addi %0, %c4_i32 : i32
    %c0_i32_12 = arith.constant 0 : i32
    %30 = arith.addi %29, %c0_i32_12 : i32
    %31 = arith.index_cast %30 : i32 to index
    %32 = memref.load %arg1[%31] : memref<32xi32, #tpu.memory_space<smem>>
    %33 = arith.index_cast %32 : i32 to index
    %c0_13 = arith.constant 0 : index
    %34 = vector.load %arg2[%33, %c0_13] : memref<100x32xf32, #tpu.memory_space<vmem>>, vector<1x32xf32>
    %c1 = arith.constant 1 : index
    %c0_14 = arith.constant 0 : index
    %35 = vector.load %arg3[%c1, %c0_14] : memref<8x128xf32, #tpu.memory_space<vmem>>, vector<1x32xf32>
    tpu.vector_store %arg3[%c1, %c0_14], %34 {strides = array<i32>} : memref<8x128xf32, #tpu.memory_space<vmem>>, vector<1x32xf32>,
    %c4_i32_15 = arith.constant 4 : i32
    %36 = arith.addi %0, %c4_i32_15 : i32
    %c1_i32_16 = arith.constant 1 : i32
    %37 = arith.addi %36, %c1_i32_16 : i32
    %38 = arith.index_cast %37 : i32 to index
    %39 = memref.load %arg1[%38] : memref<32xi32, #tpu.memory_space<smem>>
    %40 = arith.index_cast %39 : i32 to index
    %c0_17 = arith.constant 0 : index
    %41 = vector.load %arg2[%40, %c0_17] : memref<100x32xf32, #tpu.memory_space<vmem>>, vector<1x32xf32>
    %c1_18 = arith.constant 1 : index
    %c32_19 = arith.constant 32 : index
    %42 = vector.load %arg3[%c1_18, %c32_19] : memref<8x128xf32, #tpu.memory_space<vmem>>, vector<1x32xf32>
    tpu.vector_store %arg3[%c1_18, %c32_19], %41 {strides = array<i32>} : memref<8x128xf32, #tpu.memory_space<vmem>>, vector<1x32xf32>,
    %c4_i32_20 = arith.constant 4 : i32
    %43 = arith.addi %0, %c4_i32_20 : i32
    %c2_i32_21 = arith.constant 2 : i32
    %44 = arith.addi %43, %c2_i32_21 : i32
    %45 = arith.index_cast %44 : i32 to index
    %46 = memref.load %arg1[%45] : memref<32xi32, #tpu.memory_space<smem>>
    %47 = arith.index_cast %46 : i32 to index
    %c0_22 = arith.constant 0 : index
    %48 = vector.load %arg2[%47, %c0_22] : memref<100x32xf32, #tpu.memory_space<vmem>>, vector<1x32xf32>
    %c1_23 = arith.constant 1 : index
    %c64_24 = arith.constant 64 : index
    %49 = vector.load %arg3[%c1_23, %c64_24] : memref<8x128xf32, #tpu.memory_space<vmem>>, vector<1x32xf32>
    tpu.vector_store %arg3[%c1_23, %c64_24], %48 {strides = array<i32>} : memref<8x128xf32, #tpu.memory_space<vmem>>, vector<1x32xf32>,
    %c4_i32_25 = arith.constant 4 : i32
    %50 = arith.addi %0, %c4_i32_25 : i32
    %c3_i32_26 = arith.constant 3 : i32
    %51 = arith.addi %50, %c3_i32_26 : i32
    %52 = arith.index_cast %51 : i32 to index
    %53 = memref.load %arg1[%52] : memref<32xi32, #tpu.memory_space<smem>>
    %54 = arith.index_cast %53 : i32 to index
    %c0_27 = arith.constant 0 : index
    %55 = vector.load %arg2[%54, %c0_27] : memref<100x32xf32, #tpu.memory_space<vmem>>, vector<1x32xf32>
    %c1_28 = arith.constant 1 : index
    %c96_29 = arith.constant 96 : index
    %56 = vector.load %arg3[%c1_28, %c96_29] : memref<8x128xf32, #tpu.memory_space<vmem>>, vector<1x32xf32>
    tpu.vector_store %arg3[%c1_28, %c96_29], %55 {strides = array<i32>} : memref<8x128xf32, #tpu.memory_space<vmem>>, vector<1x32xf32>,
    %c8_i32 = arith.constant 8 : i32
    %57 = arith.addi %0, %c8_i32 : i32
    %c0_i32_30 = arith.constant 0 : i32
    %58 = arith.addi %57, %c0_i32_30 : i32
    %59 = arith.index_cast %58 : i32 to index
    %60 = memref.load %arg1[%59] : memref<32xi32, #tpu.memory_space<smem>>
    %61 = arith.index_cast %60 : i32 to index
    %c0_31 = arith.constant 0 : index
    %62 = vector.load %arg2[%61, %c0_31] : memref<100x32xf32, #tpu.memory_space<vmem>>, vector<1x32xf32>
    %c2 = arith.constant 2 : index
    %c0_32 = arith.constant 0 : index
    %63 = vector.load %arg3[%c2, %c0_32] : memref<8x128xf32, #tpu.memory_space<vmem>>, vector<1x32xf32>
    tpu.vector_store %arg3[%c2, %c0_32], %62 {strides = array<i32>} : memref<8x128xf32, #tpu.memory_space<vmem>>, vector<1x32xf32>,
    %c8_i32_33 = arith.constant 8 : i32
    %64 = arith.addi %0, %c8_i32_33 : i32
    %c1_i32_34 = arith.constant 1 : i32
    %65 = arith.addi %64, %c1_i32_34 : i32
    %66 = arith.index_cast %65 : i32 to index
    %67 = memref.load %arg1[%66] : memref<32xi32, #tpu.memory_space<smem>>
    %68 = arith.index_cast %67 : i32 to index
    %c0_35 = arith.constant 0 : index
    %69 = vector.load %arg2[%68, %c0_35] : memref<100x32xf32, #tpu.memory_space<vmem>>, vector<1x32xf32>
    %c2_36 = arith.constant 2 : index
    %c32_37 = arith.constant 32 : index
    %70 = vector.load %arg3[%c2_36, %c32_37] : memref<8x128xf32, #tpu.memory_space<vmem>>, vector<1x32xf32>
    tpu.vector_store %arg3[%c2_36, %c32_37], %69 {strides = array<i32>} : memref<8x128xf32, #tpu.memory_space<vmem>>, vector<1x32xf32>,
    %c8_i32_38 = arith.constant 8 : i32
    %71 = arith.addi %0, %c8_i32_38 : i32
    %c2_i32_39 = arith.constant 2 : i32
    %72 = arith.addi %71, %c2_i32_39 : i32
    %73 = arith.index_cast %72 : i32 to index
    %74 = memref.load %arg1[%73] : memref<32xi32, #tpu.memory_space<smem>>
    %75 = arith.index_cast %74 : i32 to index
    %c0_40 = arith.constant 0 : index
    %76 = vector.load %arg2[%75, %c0_40] : memref<100x32xf32, #tpu.memory_space<vmem>>, vector<1x32xf32>
    %c2_41 = arith.constant 2 : index
    %c64_42 = arith.constant 64 : index
    %77 = vector.load %arg3[%c2_41, %c64_42] : memref<8x128xf32, #tpu.memory_space<vmem>>, vector<1x32xf32>
    tpu.vector_store %arg3[%c2_41, %c64_42], %76 {strides = array<i32>} : memref<8x128xf32, #tpu.memory_space<vmem>>, vector<1x32xf32>,
    %c8_i32_43 = arith.constant 8 : i32
    %78 = arith.addi %0, %c8_i32_43 : i32
    %c3_i32_44 = arith.constant 3 : i32
    %79 = arith.addi %78, %c3_i32_44 : i32
    %80 = arith.index_cast %79 : i32 to index
    %81 = memref.load %arg1[%80] : memref<32xi32, #tpu.memory_space<smem>>
    %82 = arith.index_cast %81 : i32 to index
    %c0_45 = arith.constant 0 : index
    %83 = vector.load %arg2[%82, %c0_45] : memref<100x32xf32, #tpu.memory_space<vmem>>, vector<1x32xf32>
    %c2_46 = arith.constant 2 : index
    %c96_47 = arith.constant 96 : index
    %84 = vector.load %arg3[%c2_46, %c96_47] : memref<8x128xf32, #tpu.memory_space<vmem>>, vector<1x32xf32>
    tpu.vector_store %arg3[%c2_46, %c96_47], %83 {strides = array<i32>} : memref<8x128xf32, #tpu.memory_space<vmem>>, vector<1x32xf32>,
    %c12_i32 = arith.constant 12 : i32
    %85 = arith.addi %0, %c12_i32 : i32
    %c0_i32_48 = arith.constant 0 : i32
    %86 = arith.addi %85, %c0_i32_48 : i32
    %87 = arith.index_cast %86 : i32 to index
    %88 = memref.load %arg1[%87] : memref<32xi32, #tpu.memory_space<smem>>
    %89 = arith.index_cast %88 : i32 to index
    %c0_49 = arith.constant 0 : index
    %90 = vector.load %arg2[%89, %c0_49] : memref<100x32xf32, #tpu.memory_space<vmem>>, vector<1x32xf32>
    %c3 = arith.constant 3 : index
    %c0_50 = arith.constant 0 : index
    %91 = vector.load %arg3[%c3, %c0_50] : memref<8x128xf32, #tpu.memory_space<vmem>>, vector<1x32xf32>
    tpu.vector_store %arg3[%c3, %c0_50], %90 {strides = array<i32>} : memref<8x128xf32, #tpu.memory_space<vmem>>, vector<1x32xf32>,
    %c12_i32_51 = arith.constant 12 : i32
    %92 = arith.addi %0, %c12_i32_51 : i32
    %c1_i32_52 = arith.constant 1 : i32
    %93 = arith.addi %92, %c1_i32_52 : i32
    %94 = arith.index_cast %93 : i32 to index
    %95 = memref.load %arg1[%94] : memref<32xi32, #tpu.memory_space<smem>>
    %96 = arith.index_cast %95 : i32 to index
    %c0_53 = arith.constant 0 : index
    %97 = vector.load %arg2[%96, %c0_53] : memref<100x32xf32, #tpu.memory_space<vmem>>, vector<1x32xf32>
    %c3_54 = arith.constant 3 : index
    %c32_55 = arith.constant 32 : index
    %98 = vector.load %arg3[%c3_54, %c32_55] : memref<8x128xf32, #tpu.memory_space<vmem>>, vector<1x32xf32>
    tpu.vector_store %arg3[%c3_54, %c32_55], %97 {strides = array<i32>} : memref<8x128xf32, #tpu.memory_space<vmem>>, vector<1x32xf32>,
    %c12_i32_56 = arith.constant 12 : i32
    %99 = arith.addi %0, %c12_i32_56 : i32
    %c2_i32_57 = arith.constant 2 : i32
    %100 = arith.addi %99, %c2_i32_57 : i32
    %101 = arith.index_cast %100 : i32 to index
    %102 = memref.load %arg1[%101] : memref<32xi32, #tpu.memory_space<smem>>
    %103 = arith.index_cast %102 : i32 to index
    %c0_58 = arith.constant 0 : index
    %104 = vector.load %arg2[%103, %c0_58] : memref<100x32xf32, #tpu.memory_space<vmem>>, vector<1x32xf32>
    %c3_59 = arith.constant 3 : index
    %c64_60 = arith.constant 64 : index
    %105 = vector.load %arg3[%c3_59, %c64_60] : memref<8x128xf32, #tpu.memory_space<vmem>>, vector<1x32xf32>
    tpu.vector_store %arg3[%c3_59, %c64_60], %104 {strides = array<i32>} : memref<8x128xf32, #tpu.memory_space<vmem>>, vector<1x32xf32>,
    %c12_i32_61 = arith.constant 12 : i32
    %106 = arith.addi %0, %c12_i32_61 : i32
    %c3_i32_62 = arith.constant 3 : i32
    %107 = arith.addi %106, %c3_i32_62 : i32
    %108 = arith.index_cast %107 : i32 to index
    %109 = memref.load %arg1[%108] : memref<32xi32, #tpu.memory_space<smem>>
    %110 = arith.index_cast %109 : i32 to index
    %c0_63 = arith.constant 0 : index
    %111 = vector.load %arg2[%110, %c0_63] : memref<100x32xf32, #tpu.memory_space<vmem>>, vector<1x32xf32>
    %c3_64 = arith.constant 3 : index
    %c96_65 = arith.constant 96 : index
    %112 = vector.load %arg3[%c3_64, %c96_65] : memref<8x128xf32, #tpu.memory_space<vmem>>, vector<1x32xf32>
    tpu.vector_store %arg3[%c3_64, %c96_65], %111 {strides = array<i32>} : memref<8x128xf32, #tpu.memory_space<vmem>>, vector<1x32xf32>,
    %c16_i32 = arith.constant 16 : i32
    %113 = arith.addi %0, %c16_i32 : i32
    %c0_i32_66 = arith.constant 0 : i32
    %114 = arith.addi %113, %c0_i32_66 : i32
    %115 = arith.index_cast %114 : i32 to index
    %116 = memref.load %arg1[%115] : memref<32xi32, #tpu.memory_space<smem>>
    %117 = arith.index_cast %116 : i32 to index
    %c0_67 = arith.constant 0 : index
    %118 = vector.load %arg2[%117, %c0_67] : memref<100x32xf32, #tpu.memory_space<vmem>>, vector<1x32xf32>
    %c4 = arith.constant 4 : index
    %c0_68 = arith.constant 0 : index
    %119 = vector.load %arg3[%c4, %c0_68] : memref<8x128xf32, #tpu.memory_space<vmem>>, vector<1x32xf32>
    tpu.vector_store %arg3[%c4, %c0_68], %118 {strides = array<i32>} : memref<8x128xf32, #tpu.memory_space<vmem>>, vector<1x32xf32>,
    %c16_i32_69 = arith.constant 16 : i32
    %120 = arith.addi %0, %c16_i32_69 : i32
    %c1_i32_70 = arith.constant 1 : i32
    %121 = arith.addi %120, %c1_i32_70 : i32
    %122 = arith.index_cast %121 : i32 to index
    %123 = memref.load %arg1[%122] : memref<32xi32, #tpu.memory_space<smem>>
    %124 = arith.index_cast %123 : i32 to index
    %c0_71 = arith.constant 0 : index
    %125 = vector.load %arg2[%124, %c0_71] : memref<100x32xf32, #tpu.memory_space<vmem>>, vector<1x32xf32>
    %c4_72 = arith.constant 4 : index
    %c32_73 = arith.constant 32 : index
    %126 = vector.load %arg3[%c4_72, %c32_73] : memref<8x128xf32, #tpu.memory_space<vmem>>, vector<1x32xf32>
    tpu.vector_store %arg3[%c4_72, %c32_73], %125 {strides = array<i32>} : memref<8x128xf32, #tpu.memory_space<vmem>>, vector<1x32xf32>,
    %c16_i32_74 = arith.constant 16 : i32
    %127 = arith.addi %0, %c16_i32_74 : i32
    %c2_i32_75 = arith.constant 2 : i32
    %128 = arith.addi %127, %c2_i32_75 : i32
    %129 = arith.index_cast %128 : i32 to index
    %130 = memref.load %arg1[%129] : memref<32xi32, #tpu.memory_space<smem>>
    %131 = arith.index_cast %130 : i32 to index
    %c0_76 = arith.constant 0 : index
    %132 = vector.load %arg2[%131, %c0_76] : memref<100x32xf32, #tpu.memory_space<vmem>>, vector<1x32xf32>
    %c4_77 = arith.constant 4 : index
    %c64_78 = arith.constant 64 : index
    %133 = vector.load %arg3[%c4_77, %c64_78] : memref<8x128xf32, #tpu.memory_space<vmem>>, vector<1x32xf32>
    tpu.vector_store %arg3[%c4_77, %c64_78], %132 {strides = array<i32>} : memref<8x128xf32, #tpu.memory_space<vmem>>, vector<1x32xf32>,
    %c16_i32_79 = arith.constant 16 : i32
    %134 = arith.addi %0, %c16_i32_79 : i32
    %c3_i32_80 = arith.constant 3 : i32
    %135 = arith.addi %134, %c3_i32_80 : i32
    %136 = arith.index_cast %135 : i32 to index
    %137 = memref.load %arg1[%136] : memref<32xi32, #tpu.memory_space<smem>>
    %138 = arith.index_cast %137 : i32 to index
    %c0_81 = arith.constant 0 : index
    %139 = vector.load %arg2[%138, %c0_81] : memref<100x32xf32, #tpu.memory_space<vmem>>, vector<1x32xf32>
    %c4_82 = arith.constant 4 : index
    %c96_83 = arith.constant 96 : index
    %140 = vector.load %arg3[%c4_82, %c96_83] : memref<8x128xf32, #tpu.memory_space<vmem>>, vector<1x32xf32>
    tpu.vector_store %arg3[%c4_82, %c96_83], %139 {strides = array<i32>} : memref<8x128xf32, #tpu.memory_space<vmem>>, vector<1x32xf32>,
    %c20_i32 = arith.constant 20 : i32
    %141 = arith.addi %0, %c20_i32 : i32
    %c0_i32_84 = arith.constant 0 : i32
    %142 = arith.addi %141, %c0_i32_84 : i32
    %143 = arith.index_cast %142 : i32 to index
    %144 = memref.load %arg1[%143] : memref<32xi32, #tpu.memory_space<smem>>
    %145 = arith.index_cast %144 : i32 to index
    %c0_85 = arith.constant 0 : index
    %146 = vector.load %arg2[%145, %c0_85] : memref<100x32xf32, #tpu.memory_space<vmem>>, vector<1x32xf32>
    %c5 = arith.constant 5 : index
    %c0_86 = arith.constant 0 : index
    %147 = vector.load %arg3[%c5, %c0_86] : memref<8x128xf32, #tpu.memory_space<vmem>>, vector<1x32xf32>
    tpu.vector_store %arg3[%c5, %c0_86], %146 {strides = array<i32>} : memref<8x128xf32, #tpu.memory_space<vmem>>, vector<1x32xf32>,
    %c20_i32_87 = arith.constant 20 : i32
    %148 = arith.addi %0, %c20_i32_87 : i32
    %c1_i32_88 = arith.constant 1 : i32
    %149 = arith.addi %148, %c1_i32_88 : i32
    %150 = arith.index_cast %149 : i32 to index
    %151 = memref.load %arg1[%150] : memref<32xi32, #tpu.memory_space<smem>>
    %152 = arith.index_cast %151 : i32 to index
    %c0_89 = arith.constant 0 : index
    %153 = vector.load %arg2[%152, %c0_89] : memref<100x32xf32, #tpu.memory_space<vmem>>, vector<1x32xf32>
    %c5_90 = arith.constant 5 : index
    %c32_91 = arith.constant 32 : index
    %154 = vector.load %arg3[%c5_90, %c32_91] : memref<8x128xf32, #tpu.memory_space<vmem>>, vector<1x32xf32>
    tpu.vector_store %arg3[%c5_90, %c32_91], %153 {strides = array<i32>} : memref<8x128xf32, #tpu.memory_space<vmem>>, vector<1x32xf32>,
    %c20_i32_92 = arith.constant 20 : i32
    %155 = arith.addi %0, %c20_i32_92 : i32
    %c2_i32_93 = arith.constant 2 : i32
    %156 = arith.addi %155, %c2_i32_93 : i32
    %157 = arith.index_cast %156 : i32 to index
    %158 = memref.load %arg1[%157] : memref<32xi32, #tpu.memory_space<smem>>
    %159 = arith.index_cast %158 : i32 to index
    %c0_94 = arith.constant 0 : index
    %160 = vector.load %arg2[%159, %c0_94] : memref<100x32xf32, #tpu.memory_space<vmem>>, vector<1x32xf32>
    %c5_95 = arith.constant 5 : index
    %c64_96 = arith.constant 64 : index
    %161 = vector.load %arg3[%c5_95, %c64_96] : memref<8x128xf32, #tpu.memory_space<vmem>>, vector<1x32xf32>
    tpu.vector_store %arg3[%c5_95, %c64_96], %160 {strides = array<i32>} : memref<8x128xf32, #tpu.memory_space<vmem>>, vector<1x32xf32>,
    %c20_i32_97 = arith.constant 20 : i32
    %162 = arith.addi %0, %c20_i32_97 : i32
    %c3_i32_98 = arith.constant 3 : i32
    %163 = arith.addi %162, %c3_i32_98 : i32
    %164 = arith.index_cast %163 : i32 to index
    %165 = memref.load %arg1[%164] : memref<32xi32, #tpu.memory_space<smem>>
    %166 = arith.index_cast %165 : i32 to index
    %c0_99 = arith.constant 0 : index
    %167 = vector.load %arg2[%166, %c0_99] : memref<100x32xf32, #tpu.memory_space<vmem>>, vector<1x32xf32>
    %c5_100 = arith.constant 5 : index
    %c96_101 = arith.constant 96 : index
    %168 = vector.load %arg3[%c5_100, %c96_101] : memref<8x128xf32, #tpu.memory_space<vmem>>, vector<1x32xf32>
    tpu.vector_store %arg3[%c5_100, %c96_101], %167 {strides = array<i32>} : memref<8x128xf32, #tpu.memory_space<vmem>>, vector<1x32xf32>,
    %c24_i32 = arith.constant 24 : i32
    %169 = arith.addi %0, %c24_i32 : i32
    %c0_i32_102 = arith.constant 0 : i32
    %170 = arith.addi %169, %c0_i32_102 : i32
    %171 = arith.index_cast %170 : i32 to index
    %172 = memref.load %arg1[%171] : memref<32xi32, #tpu.memory_space<smem>>
    %173 = arith.index_cast %172 : i32 to index
    %c0_103 = arith.constant 0 : index
    %174 = vector.load %arg2[%173, %c0_103] : memref<100x32xf32, #tpu.memory_space<vmem>>, vector<1x32xf32>
    %c6 = arith.constant 6 : index
    %c0_104 = arith.constant 0 : index
    %175 = vector.load %arg3[%c6, %c0_104] : memref<8x128xf32, #tpu.memory_space<vmem>>, vector<1x32xf32>
    tpu.vector_store %arg3[%c6, %c0_104], %174 {strides = array<i32>} : memref<8x128xf32, #tpu.memory_space<vmem>>, vector<1x32xf32>,
    %c24_i32_105 = arith.constant 24 : i32
    %176 = arith.addi %0, %c24_i32_105 : i32
    %c1_i32_106 = arith.constant 1 : i32
    %177 = arith.addi %176, %c1_i32_106 : i32
    %178 = arith.index_cast %177 : i32 to index
    %179 = memref.load %arg1[%178] : memref<32xi32, #tpu.memory_space<smem>>
    %180 = arith.index_cast %179 : i32 to index
    %c0_107 = arith.constant 0 : index
    %181 = vector.load %arg2[%180, %c0_107] : memref<100x32xf32, #tpu.memory_space<vmem>>, vector<1x32xf32>
    %c6_108 = arith.constant 6 : index
    %c32_109 = arith.constant 32 : index
    %182 = vector.load %arg3[%c6_108, %c32_109] : memref<8x128xf32, #tpu.memory_space<vmem>>, vector<1x32xf32>
    tpu.vector_store %arg3[%c6_108, %c32_109], %181 {strides = array<i32>} : memref<8x128xf32, #tpu.memory_space<vmem>>, vector<1x32xf32>,
    %c24_i32_110 = arith.constant 24 : i32
    %183 = arith.addi %0, %c24_i32_110 : i32
    %c2_i32_111 = arith.constant 2 : i32
    %184 = arith.addi %183, %c2_i32_111 : i32
    %185 = arith.index_cast %184 : i32 to index
    %186 = memref.load %arg1[%185] : memref<32xi32, #tpu.memory_space<smem>>
    %187 = arith.index_cast %186 : i32 to index
    %c0_112 = arith.constant 0 : index
    %188 = vector.load %arg2[%187, %c0_112] : memref<100x32xf32, #tpu.memory_space<vmem>>, vector<1x32xf32>
    %c6_113 = arith.constant 6 : index
    %c64_114 = arith.constant 64 : index
    %189 = vector.load %arg3[%c6_113, %c64_114] : memref<8x128xf32, #tpu.memory_space<vmem>>, vector<1x32xf32>
    tpu.vector_store %arg3[%c6_113, %c64_114], %188 {strides = array<i32>} : memref<8x128xf32, #tpu.memory_space<vmem>>, vector<1x32xf32>,
    %c24_i32_115 = arith.constant 24 : i32
    %190 = arith.addi %0, %c24_i32_115 : i32
    %c3_i32_116 = arith.constant 3 : i32
    %191 = arith.addi %190, %c3_i32_116 : i32
    %192 = arith.index_cast %191 : i32 to index
    %193 = memref.load %arg1[%192] : memref<32xi32, #tpu.memory_space<smem>>
    %194 = arith.index_cast %193 : i32 to index
    %c0_117 = arith.constant 0 : index
    %195 = vector.load %arg2[%194, %c0_117] : memref<100x32xf32, #tpu.memory_space<vmem>>, vector<1x32xf32>
    %c6_118 = arith.constant 6 : index
    %c96_119 = arith.constant 96 : index
    %196 = vector.load %arg3[%c6_118, %c96_119] : memref<8x128xf32, #tpu.memory_space<vmem>>, vector<1x32xf32>
    tpu.vector_store %arg3[%c6_118, %c96_119], %195 {strides = array<i32>} : memref<8x128xf32, #tpu.memory_space<vmem>>, vector<1x32xf32>,
    %c28_i32 = arith.constant 28 : i32
    %197 = arith.addi %0, %c28_i32 : i32
    %c0_i32_120 = arith.constant 0 : i32
    %198 = arith.addi %197, %c0_i32_120 : i32
    %199 = arith.index_cast %198 : i32 to index
    %200 = memref.load %arg1[%199] : memref<32xi32, #tpu.memory_space<smem>>
    %201 = arith.index_cast %200 : i32 to index
    %c0_121 = arith.constant 0 : index
    %202 = vector.load %arg2[%201, %c0_121] : memref<100x32xf32, #tpu.memory_space<vmem>>, vector<1x32xf32>
    %c7 = arith.constant 7 : index
    %c0_122 = arith.constant 0 : index
    %203 = vector.load %arg3[%c7, %c0_122] : memref<8x128xf32, #tpu.memory_space<vmem>>, vector<1x32xf32>
    tpu.vector_store %arg3[%c7, %c0_122], %202 {strides = array<i32>} : memref<8x128xf32, #tpu.memory_space<vmem>>, vector<1x32xf32>,
    %c28_i32_123 = arith.constant 28 : i32
    %204 = arith.addi %0, %c28_i32_123 : i32
    %c1_i32_124 = arith.constant 1 : i32
    %205 = arith.addi %204, %c1_i32_124 : i32
    %206 = arith.index_cast %205 : i32 to index
    %207 = memref.load %arg1[%206] : memref<32xi32, #tpu.memory_space<smem>>
    %208 = arith.index_cast %207 : i32 to index
    %c0_125 = arith.constant 0 : index
    %209 = vector.load %arg2[%208, %c0_125] : memref<100x32xf32, #tpu.memory_space<vmem>>, vector<1x32xf32>
    %c7_126 = arith.constant 7 : index
    %c32_127 = arith.constant 32 : index
    %210 = vector.load %arg3[%c7_126, %c32_127] : memref<8x128xf32, #tpu.memory_space<vmem>>, vector<1x32xf32>
    tpu.vector_store %arg3[%c7_126, %c32_127], %209 {strides = array<i32>} : memref<8x128xf32, #tpu.memory_space<vmem>>, vector<1x32xf32>,
    %c28_i32_128 = arith.constant 28 : i32
    %211 = arith.addi %0, %c28_i32_128 : i32
    %c2_i32_129 = arith.constant 2 : i32
    %212 = arith.addi %211, %c2_i32_129 : i32
    %213 = arith.index_cast %212 : i32 to index
    %214 = memref.load %arg1[%213] : memref<32xi32, #tpu.memory_space<smem>>
    %215 = arith.index_cast %214 : i32 to index
    %c0_130 = arith.constant 0 : index
    %216 = vector.load %arg2[%215, %c0_130] : memref<100x32xf32, #tpu.memory_space<vmem>>, vector<1x32xf32>
    %c7_131 = arith.constant 7 : index
    %c64_132 = arith.constant 64 : index
    %217 = vector.load %arg3[%c7_131, %c64_132] : memref<8x128xf32, #tpu.memory_space<vmem>>, vector<1x32xf32>
    tpu.vector_store %arg3[%c7_131, %c64_132], %216 {strides = array<i32>} : memref<8x128xf32, #tpu.memory_space<vmem>>, vector<1x32xf32>,
    %c28_i32_133 = arith.constant 28 : i32
    %218 = arith.addi %0, %c28_i32_133 : i32
    %c3_i32_134 = arith.constant 3 : i32
    %219 = arith.addi %218, %c3_i32_134 : i32
    %220 = arith.index_cast %219 : i32 to index
    %221 = memref.load %arg1[%220] : memref<32xi32, #tpu.memory_space<smem>>
    %222 = arith.index_cast %221 : i32 to index
    %c0_135 = arith.constant 0 : index
    %223 = vector.load %arg2[%222, %c0_135] : memref<100x32xf32, #tpu.memory_space<vmem>>, vector<1x32xf32>
    %c7_136 = arith.constant 7 : index
    %c96_137 = arith.constant 96 : index
    %224 = vector.load %arg3[%c7_136, %c96_137] : memref<8x128xf32, #tpu.memory_space<vmem>>, vector<1x32xf32>
    tpu.vector_store %arg3[%c7_136, %c96_137], %223 {strides = array<i32>} : memref<8x128xf32, #tpu.memory_space<vmem>>, vector<1x32xf32>,
    return
  }
  func.func @transform_0(%arg0: i32, %arg1: memref<32xi32, #tpu.memory_space<smem>>) -> (i32, i32) {
    %c0_i32 = arith.constant 0 : i32
    %c0_i32_0 = arith.constant 0 : i32
    %c0_i32_1 = arith.constant 0 : i32
    return %c0_i32, %c0_i32_0 : i32, i32
  }
  func.func @transform_1(%arg0: i32, %arg1: memref<32xi32, #tpu.memory_space<smem>>) -> (i32, i32) {
    %c0_i32 = arith.constant 0 : i32
    %c0_i32_0 = arith.constant 0 : i32
    return %arg0, %c0_i32 : i32, i32
  }
}

</mosaic_0001>

<bundles_post_ra>
// kernel: tpu_custom_call.1
= control target key start
LH: loop header
LB: loop body
LE: loop exit
PB: predicated region body
PF: predicated region fallthrough
CT: control target
= control target key end

     0   :  { %s623_s0 = inlined_call_operand.vmem [shape: s32[32], index: 0, kind: input, shape index: {}]   ;;  %s624_s1 = inlined_call_operand.vmem [shape: f32[100,32], index: 1, kind: input, shape index: {}]   ;;  %s625_s2 = inlined_call_operand.hbm [shape: f32[8,128], index: 2, kind: output, shape index: {}]  }
   0x1   :  { %s7_s11 = sshll.u32 %s623_s0, 4  ;;  %s8_s11 = int_to_ptr.vmem [resolvable:$true] %s7_s11 }
   0x2   :  { %s358_s12 = scalar_lea.vmem %s8_s11, 16  ;;  %p363_p1 = scmp.lt.s32.totalorder %s8_s11, %s8_s11 }
   0x3   :  { %p359_p0 = scmp.ne.s32.totalorder %s8_s11, %s358_s12  ;;  %p364_p2 = scmp.lt.s32.totalorder %s358_s12, %s358_s12 }
   0x5   :  { %p365_p3 = por %p364_p2, %p363_p1 }
   0x7   :  { %p366_p4 = pnand %p365_p3, %p359_p0 }
   0x9   :  { %369 = shalt.err (!%p366_p4)  }
   0xa   :  { %s396_s13 = smov [#allocation3]  }
   0xb   :  { %10 = dma.vmem_to_smem %s8_s11, 16, %s396_s13, [#allocation2] }
   0xc   :  { %392 = dma.done.wait [#allocation2], 16 }
   0xd   :  { %393 = vsyncadd [#allocation2], 4294967280 }
   0xe   :  { %12 = sfence }
   0xf   :  { %s330_s14 = sld [smem:[#allocation3 + $0x9]]  ;;  %s334_s16 = sld [smem:[#allocation3 + $0xd]] }
  0x10   :  { %s322_s15 = sld [smem:[#allocation3 + $0x1]] }
  0x11   :  { %13 = vsyncpa [#allocation5], 0  ;;  %s326_s17 = sld [smem:[#allocation3 + $0x5]]  ;;  %s338_s0 = sld [smem:[#allocation3 + $0x11]]  ;;  %vm20_vm0 = vcmask 253952   ;;  %vm30_vm1 = vcmask 516352  }
  0x12   :  { %s342_s18 = sld [smem:[#allocation3 + $0x15]]  ;;  %s346_s23 = sld [smem:[#allocation3 + $0x19]]  ;;  %vm40_vm2 = vcmask 778752   ;;  %vm50_vm3 = vcmask 1041152  }
  0x13   :  { %s350_s19 = sld [smem:[#allocation3 + $0x1d]]  ;;  %s397_s30 = smov 32  }
  0x14   :  { %s327_s9 = sld [smem:[#allocation3 + $0x6]]  ;;  %s323_s13 = sld [smem:[#allocation3 + $0x2]] }
  0x15   :  { %s91_s22 = scalar_lea.vmem %s624_s1, %s330_s14  ;;  %s123_s29 = scalar_lea.vmem %s624_s1, %s334_s16 }
  0x16   :  { %v92_v0 = vld [vmem:[%s91_s22] sm:$0x1]  ;;  %s24_s26 = scalar_lea.vmem %s624_s1, %s322_s15  ;;  %s440_s14 = sld [smem:[#allocation3 + $0xe]] }
  0x17   :  { %94 = vrot.lane.b32.xlu1 %v92_v0, %s397_s30  ;;  %v25_v1 = vld [vmem:[%s24_s26] sm:$0x1]  ;;  %s59_s5 = scalar_lea.vmem %s624_s1, %s326_s17  ;;  %s155_s12 = scalar_lea.vmem %s624_s1, %s338_s0 }
  0x18   :  { %27 = vrot.lane.b32.xlu0 %v25_v1, %s397_s30  ;;  %v124_v2 = vld [vmem:[%s123_s29] sm:$0x1]  ;;  %s187_s8 = scalar_lea.vmem %s624_s1, %s342_s18  ;;  %s446_s18 = sld [smem:[#allocation3 + $0xa]] }
  0x19   :  { %v60_v3 = vld [vmem:[%s59_s5] sm:$0x1]  ;;  %s251_s17 = scalar_lea.vmem %s624_s1, %s350_s19  ;;  %s219_s0 = scalar_lea.vmem %s624_s1, %s346_s23 }
  0x1a   :  { %v188_v4 = vld [vmem:[%s187_s8] sm:$0x1]  ;;  %s452_s22 = sld [smem:[#allocation3 + $0x16]]  ;;  %s68_s26 = scalar_lea.vmem %s624_s1, %s327_s9 }
  0x1b   :  { %126 = vrot.lane.b32.xlu1 %v124_v2, %s397_s30  ;;  %v156_v5 = vld [vmem:[%s155_s12] sm:$0x1]  ;;  %s458_s19 = sld [smem:[#allocation3 + $0x12]]  ;;  %s34_s23 = scalar_lea.vmem %s624_s1, %s323_s13 }
  0x1c   :  { %62 = vrot.lane.b32.xlu0 %v60_v3, %s397_s30  ;;  %v252_v6 = vld [vmem:[%s251_s17] sm:$0x1]  ;;  %s132_s4 = scalar_lea.vmem %s624_s1, %s440_s14  ;;  %s468_s5 = sld [smem:[#allocation3 + $0x1e]] }
  0x1d   :  { %v220_v7 = vld [vmem:[%s219_s0] sm:$0x1]  ;;  %s471_s6 = sld [smem:[#allocation3 + $0x1a]]  ;;  %s473_s7 = sld [smem:[#allocation3 + $0x7]] }
  0x1e   :  { %v69_v8 = vld [vmem:[%s68_s26] sm:$0x1]  ;;  %s100_s10 = scalar_lea.vmem %s624_s1, %s446_s18  ;;  %s479_s11 = sld [smem:[#allocation3 + $0x3]] }
  0x1f   :  { %190 = vrot.lane.b32.xlu1 %v188_v4, %s397_s30  ;;  %v35_v9 = vld [vmem:[%s34_s23] sm:$0x1]  ;;  %s481_s12 = sld [smem:[#allocation3 + $0xf]]  ;;  %s483_s13 = sld [smem:[#allocation3 + $0xb]] }
  0x20   :  { %158 = vrot.lane.b32.xlu0 %v156_v5, %s397_s30  ;;  %s398_s14 = smov 64   ;;  %s196_s16 = scalar_lea.vmem %s624_s1, %s452_s22  ;;  %v133_v10 = vld [vmem:[%s132_s4] sm:$0x1] }
  0x21   :  { %s329_s17 = sld [smem:[#allocation3 + $0x8]]  ;;  %s333_s18 = sld [smem:[#allocation3 + $0xc]]  ;;  %v101_v11 = vld [vmem:[%s100_s10] sm:$0x1] }
  0x22   :  { %s17_s20 = sld [smem:[#allocation3]]  ;;  %s164_s24 = scalar_lea.vmem %s624_s1, %s458_s19  ;;  %v197_v12 = vld [vmem:[%s196_s16] sm:$0x1] }
  0x23   :  { %254 = vrot.lane.b32.xlu1 %v252_v6, %s397_s30  ;;  %s325_s25 = sld [smem:[#allocation3 + $0x4]]  ;;  %s497_s27 = sld [smem:[#allocation3 + $0x10]]  ;;  %v165_v13 = vld [vmem:[%s164_s24] sm:$0x1] }
  0x24   :  { %222 = vrot.lane.b32.xlu0 %v220_v7, %s397_s30  ;;  %s495_s26 = sld [smem:[#allocation3 + $0x14]]  ;;  %s500_s22 = sld [smem:[#allocation3 + $0x17]] }
  0x25   :  { %s502_s28 = sld [smem:[#allocation3 + $0x1c]]  ;;  %s260_s3 = scalar_lea.vmem %s624_s1, %s468_s5 }
  0x26   :  { %s509_s19 = sld [smem:[#allocation3 + $0x18]]  ;;  %s228_s9 = scalar_lea.vmem %s624_s1, %s471_s6  ;;  %v261_v17 = vld [vmem:[%s260_s3] sm:$0x1] }
  0x27   :  { %71 = vrot.lane.b32.xlu1 %v69_v8, %s398_s14  ;;  %s86_s15 = scalar_lea.vmem %s624_s1, %s329_s17  ;;  %s118_s24 = scalar_lea.vmem %s624_s1, %s333_s18  ;;  %v229_v19 = vld [vmem:[%s228_s9] sm:$0x1] }
  0x28   :  { %37 = vrot.lane.b32.xlu0 %v35_v9, %s398_s14  ;;  %v87_v14 = vld [vmem:[%s86_s15] sm:$0x1]  ;;  %s18_s0 = scalar_lea.vmem %s624_s1, %s17_s20  ;;  %s525_s29 = sld [smem:[#allocation3 + $0x13]] }
  0x29   :  { %88 = vst.msk [vmem:[#allocation4 + $0x2] sm:$0x1] %vm20_vm0, %v87_v14  ;;  %v19_v15 = vld [vmem:[%s18_s0] sm:$0x1]  ;;  %s54_s4 = scalar_lea.vmem %s624_s1, %s325_s25  ;;  %s150_s15 = scalar_lea.vmem %s624_s1, %s497_s27 }
  0x2a   :  { %v119_v16 = vld [vmem:[%s118_s24] sm:$0x1]  ;;  %21 = vst.msk [vmem:[#allocation4] sm:$0x1] %vm20_vm0, %v19_v15  ;;  %s182_s8 = scalar_lea.vmem %s624_s1, %s495_s26  ;;  %s77_s21 = scalar_lea.vmem %s624_s1, %s473_s7 }
  0x2b   :  { %135 = vrot.lane.b32.xlu1 %v133_v10, %s398_s14  ;;  %120 = vst.msk [vmem:[#allocation4 + $0x3] sm:$0x1] %vm20_vm0, %v119_v16  ;;  %v55_v18 = vld [vmem:[%s54_s4] sm:$0x1]  ;;  %s246_s5 = scalar_lea.vmem %s624_s1, %s502_s28  ;;  %s44_s24 = scalar_lea.vmem %s624_s1, %s479_s11 }
  0x2c   :  { %103 = vrot.lane.b32.xlu0 %v101_v11, %s398_s14  ;;  %56 = vst.msk [vmem:[#allocation4 + $0x1] sm:$0x1] %vm20_vm0, %v55_v18  ;;  %v183_v20 = vld [vmem:[%s182_s8] sm:$0x1]  ;;  %s214_s9 = scalar_lea.vmem %s624_s1, %s509_s19  ;;  %s141_s6 = scalar_lea.vmem %s624_s1, %s481_s12 }
  0x2d   :  { %v151_v21 = vld [vmem:[%s150_s15] sm:$0x1]  ;;  %184 = vst.msk [vmem:[#allocation4 + $0x5] sm:$0x1] %vm20_vm0, %v183_v20  ;;  %s352_s17 = sld [smem:[#allocation3 + $0x1f]]  ;;  %s109_s20 = scalar_lea.vmem %s624_s1, %s483_s13 }
  0x2e   :  { %152 = vst.msk [vmem:[#allocation4 + $0x4] sm:$0x1] %vm20_vm0, %v151_v21  ;;  %v247_v22 = vld [vmem:[%s246_s5] sm:$0x1]  ;;  %s348_s18 = sld [smem:[#allocation3 + $0x1b]]  ;;  %s399_s8 = smov 96  }
  0x2f   :  { %199 = vrot.lane.b32.xlu1 %v197_v12, %s398_s14  ;;  %248 = vst.msk [vmem:[#allocation4 + $0x7] sm:$0x1] %vm20_vm0, %v247_v22  ;;  %v215_v23 = vld [vmem:[%s214_s9] sm:$0x1]  ;;  %s205_s30 = scalar_lea.vmem %s624_s1, %s500_s22  ;;  %s173_s25 = scalar_lea.vmem %s624_s1, %s525_s29 }
  0x30   :  { %167 = vrot.lane.b32.xlu0 %v165_v13, %s398_s14  ;;  %v78_v24 = vld [vmem:[%s77_s21] sm:$0x1]  ;;  %216 = vst.msk [vmem:[#allocation4 + $0x6] sm:$0x1] %vm20_vm0, %v215_v23 }
  0x31   :  { %v45_v25 = vld [vmem:[%s44_s24] sm:$0x1] }
  0x32   :  { %v142_v26 = vld [vmem:[%s141_s6] sm:$0x1] }
  0x33   :  { %263 = vrot.lane.b32.xlu1 %v261_v17, %s398_s14  ;;  %v110_v27 = vld [vmem:[%s109_s20] sm:$0x1]  ;;  %s269_s21 = scalar_lea.vmem %s624_s1, %s352_s17 }
  0x34   :  { %231 = vrot.lane.b32.xlu0 %v229_v19, %s398_s14  ;;  %v206_v28 = vld [vmem:[%s205_s30] sm:$0x1]  ;;  %s237_s5 = scalar_lea.vmem %s624_s1, %s348_s18  ;;  %s400_s1 = smov [#allocation4]  }
  0x35   :  { %v174_v29 = vld [vmem:[%s173_s25] sm:$0x1]  ;;  %s282_s22 = sshll.u32 %s400_s1, 4  ;;  %s283_s22 = int_to_ptr.vmem [resolvable:$true] %s282_s22 }
  0x36   :  { %v270_v30 = vld [vmem:[%s269_s21] sm:$0x1]  ;;  %s370_s29 = scalar_lea.vmem %s283_s22, 128  ;;  %p375_p6 = scmp.lt.s32.totalorder %s283_s22, %s283_s22 }
  0x37   :  { %80 = vrot.lane.b32.xlu1 %v78_v24, %s399_s8  ;;  %v238_v31 = vld [vmem:[%s237_s5] sm:$0x1]  ;;  %p371_p5 = scmp.ne.s32.totalorder %s283_s22, %s370_s29  ;;  %p376_p7 = scmp.lt.s32.totalorder %s370_s29, %s370_s29 }
  0x38   :  { %47 = vrot.lane.b32.xlu0 %v45_v25, %s399_s8 }
  0x39   :  { %p377_p8 = por %p376_p7, %p375_p6 }
  0x3b   :  { %144 = vrot.lane.b32.xlu1 %v142_v26, %s399_s8  ;;  %p378_p9 = pnand %p377_p8, %p371_p5 }
  0x3c   :  { %112 = vrot.lane.b32.xlu0 %v110_v27, %s399_s8 }
  0x3f   :  { %208 = vrot.lane.b32.xlu1 %v206_v28, %s399_s8 }
  0x40   :  { %176 = vrot.lane.b32.xlu0 %v174_v29, %s399_s8 }
  0x43   :  { %272 = vrot.lane.b32.xlu1 %v270_v30, %s399_s8 }
  0x44   :  { %240 = vrot.lane.b32.xlu0 %v238_v31, %s399_s8 }
  0x89   :  { %v95_v32 = vpop.permute.xlu1 %94 }
  0x8a   :  { %97 = vst.msk [vmem:[#allocation4 + $0x2] sm:$0x1] %vm30_vm1, %v95_v32  ;;  %v28_v33 = vpop.permute.xlu0 %27 }
  0x8b   :  { %31 = vst.msk [vmem:[#allocation4] sm:$0x1] %vm30_vm1, %v28_v33 }
  0x8d   :  { %v127_v34 = vpop.permute.xlu1 %126 }
  0x8e   :  { %129 = vst.msk [vmem:[#allocation4 + $0x3] sm:$0x1] %vm30_vm1, %v127_v34  ;;  %v63_v35 = vpop.permute.xlu0 %62 }
  0x8f   :  { %65 = vst.msk [vmem:[#allocation4 + $0x1] sm:$0x1] %vm30_vm1, %v63_v35 }
  0x91   :  { %v191_v36 = vpop.permute.xlu1 %190 }
  0x92   :  { %193 = vst.msk [vmem:[#allocation4 + $0x5] sm:$0x1] %vm30_vm1, %v191_v36  ;;  %v159_v37 = vpop.permute.xlu0 %158 }
  0x93   :  { %161 = vst.msk [vmem:[#allocation4 + $0x4] sm:$0x1] %vm30_vm1, %v159_v37 }
  0x95   :  { %v255_v38 = vpop.permute.xlu1 %254 }
  0x96   :  { %257 = vst.msk [vmem:[#allocation4 + $0x7] sm:$0x1] %vm30_vm1, %v255_v38  ;;  %v223_v39 = vpop.permute.xlu0 %222 }
  0x97   :  { %225 = vst.msk [vmem:[#allocation4 + $0x6] sm:$0x1] %vm30_vm1, %v223_v39 }
  0x99   :  { %v72_v40 = vpop.permute.xlu1 %71 }
  0x9a   :  { %74 = vst.msk [vmem:[#allocation4 + $0x1] sm:$0x1] %vm40_vm2, %v72_v40  ;;  %v38_v41 = vpop.permute.xlu0 %37 }
  0x9b   :  { %41 = vst.msk [vmem:[#allocation4] sm:$0x1] %vm40_vm2, %v38_v41 }
  0x9d   :  { %v136_v42 = vpop.permute.xlu1 %135 }
  0x9e   :  { %138 = vst.msk [vmem:[#allocation4 + $0x3] sm:$0x1] %vm40_vm2, %v136_v42  ;;  %v104_v43 = vpop.permute.xlu0 %103 }
  0x9f   :  { %106 = vst.msk [vmem:[#allocation4 + $0x2] sm:$0x1] %vm40_vm2, %v104_v43 }
  0xa1   :  { %v200_v44 = vpop.permute.xlu1 %199 }
  0xa2   :  { %202 = vst.msk [vmem:[#allocation4 + $0x5] sm:$0x1] %vm40_vm2, %v200_v44  ;;  %v168_v45 = vpop.permute.xlu0 %167 }
  0xa3   :  { %170 = vst.msk [vmem:[#allocation4 + $0x4] sm:$0x1] %vm40_vm2, %v168_v45 }
  0xa5   :  { %v264_v46 = vpop.permute.xlu1 %263 }
  0xa6   :  { %266 = vst.msk [vmem:[#allocation4 + $0x7] sm:$0x1] %vm40_vm2, %v264_v46  ;;  %v232_v47 = vpop.permute.xlu0 %231 }
  0xa7   :  { %234 = vst.msk [vmem:[#allocation4 + $0x6] sm:$0x1] %vm40_vm2, %v232_v47 }
  0xa9   :  { %v81_v48 = vpop.permute.xlu1 %80 }
  0xaa   :  { %83 = vst.msk [vmem:[#allocation4 + $0x1] sm:$0x1] %vm50_vm3, %v81_v48  ;;  %v48_v49 = vpop.permute.xlu0 %47 }
  0xab   :  { %51 = vst.msk [vmem:[#allocation4] sm:$0x1] %vm50_vm3, %v48_v49 }
  0xad   :  { %v145_v50 = vpop.permute.xlu1 %144 }
  0xae   :  { %147 = vst.msk [vmem:[#allocation4 + $0x3] sm:$0x1] %vm50_vm3, %v145_v50  ;;  %v113_v51 = vpop.permute.xlu0 %112 }
  0xaf   :  { %115 = vst.msk [vmem:[#allocation4 + $0x2] sm:$0x1] %vm50_vm3, %v113_v51 }
  0xb1   :  { %v209_v52 = vpop.permute.xlu1 %208 }
  0xb2   :  { %211 = vst.msk [vmem:[#allocation4 + $0x5] sm:$0x1] %vm50_vm3, %v209_v52  ;;  %v177_v53 = vpop.permute.xlu0 %176 }
  0xb3   :  { %179 = vst.msk [vmem:[#allocation4 + $0x4] sm:$0x1] %vm50_vm3, %v177_v53 }
  0xb5   :  { %v273_v54 = vpop.permute.xlu1 %272 }
  0xb6   :  { %275 = vst.msk [vmem:[#allocation4 + $0x7] sm:$0x1] %vm50_vm3, %v273_v54  ;;  %v241_v55 = vpop.permute.xlu0 %240 }
  0xb7   :  { %243 = vst.msk [vmem:[#allocation4 + $0x6] sm:$0x1] %vm50_vm3, %v241_v55 }
  0xb8   :  { %381 = shalt.err (!%p378_p9)
}
  0xb9   :  { %s382_s24 = scalar_lea.hbm %s625_s2, 128 }
  0xba   :  { %p383_p10 = scmp.ne.s32.totalorder %s625_s2, %s382_s24  ;;  %p386_p11 = scmp.lt.u32.totalorder %s382_s24, %s625_s2 }
  0xbc   :  { %p388_p12 = pnand %p386_p11, %p383_p10 }
  0xbe   :  { %391 = shalt.err (!%p388_p12)
}
  0xbf   :  { %285 = dma.vmem_to_hbm [thread:$0]  %s283_s22, 128, %s625_s2, [#allocation5]  }
  0xc0   :  { %394 = dma.done.wait [#allocation5], 128  }
  0xc1   :  { %395 = vsyncadd [#allocation5], 4294967168 }
  0xc2   :  { %289 = vsyncpa [#allocation5], 1 }

</bundles_post_ra>
